<compile_context>
chip_gen: v6e
topology: v6e:2x2x1
jax: 0.10.0
libtpu: 0.0.40
codegen_flags: <defaults>
</compile_context>

<pallas_src>
import jax
import jax.numpy as jnp
from jax.experimental import pallas as pl
from jax.experimental.pallas import tpu as pltpu

LANE = 128
SUBLANE = 8
DEFAULT_TB = 2048              # f32 x tile: 2048*784*4B ~= 6.3 MiB; x2 buffers fits all gens
SMALL_BATCH_XLA_CUTOFF = 256   # below this, a plain XLA dot beats pallas launch overhead


def _round_up(x, m):
    return ((x + m - 1) // m) * m


def _linear_kernel(x_ref, w_ref, b_ref, o_ref):
    # x_ref: (TB, K) f32   w_ref: (K, Np)   b_ref: (1, Np) f32   o_ref: (TB, Np) f32
    x = x_ref[...].astype(w_ref.dtype)               # no-op for f32; in-kernel cast otherwise
    acc = jnp.dot(x, w_ref[...], preferred_element_type=jnp.float32)
    o_ref[...] = (acc + b_ref[...]).astype(o_ref.dtype)   # f32 bias add, lane-dense store


def prepare_params(weight, bias, compute_dtype=jnp.float32):
    """One-time padding + transpose of the Linear parameters.

    weight: (out_dim, in_dim), bias: (out_dim,) ->
      w_pad: (in_dim, Np) compute_dtype (W.T, N zero-padded to 128), b_pad: (1, Np) f32.
    K is NOT padded (a full-dim last block is legal and padding it only adds HBM bytes).
    """
    out_dim, in_dim = weight.shape
    np_ = _round_up(out_dim, LANE)
    w_pad = jnp.zeros((in_dim, np_), compute_dtype)
    w_pad = w_pad.at[:, :out_dim].set(weight.T.astype(compute_dtype))
    b_pad = jnp.zeros((1, np_), jnp.float32)
    b_pad = b_pad.at[0, :out_dim].set(bias.astype(jnp.float32))
    return w_pad, b_pad


def simple_linear_classifier_forward(x_nchw, w_pad, b_pad, out_dim, *,
                                     tb=DEFAULT_TB,
                                     small_batch_xla_cutoff=SMALL_BATCH_XLA_CUTOFF,
                                     trim_output=True):
    """x_nchw: (B, C, H, W); w_pad/b_pad from prepare_params; returns (B, out_dim) f32
    (or the padded (B, 128) array if trim_output=False, for consumers that index it)."""
    B = x_nchw.shape[0]
    x2d = x_nchw.reshape(B, -1)                       # torch .view(B, -1); no cast, no pad
    in_dim = x2d.shape[1]
    K, Np = w_pad.shape
    assert in_dim == K, f"flattened input dim {in_dim} != weight in_dim {K}"

    if B <= small_batch_xla_cutoff:
        # Small-batch fast path: single sub-vreg tile; skip pallas_call fixed overhead.
        out_full = (jnp.dot(x2d.astype(w_pad.dtype), w_pad,
                            preferred_element_type=jnp.float32) + b_pad)
    else:
        tb = min(tb, _round_up(B, SUBLANE))           # don't over-tile small batches
        grid = (pl.cdiv(B, tb),)                      # ragged final block masked by Pallas
        out_full = pl.pallas_call(
            _linear_kernel,
            out_shape=jax.ShapeDtypeStruct((B, Np), jnp.float32),
            grid_spec=pltpu.PrefetchScalarGridSpec(
                num_scalar_prefetch=0,
                grid=grid,
                in_specs=[
                    pl.BlockSpec((tb, K), lambda i: (i, 0)),    # x: batch-tiled, raw f32
                    pl.BlockSpec((K, Np), lambda i: (0, 0)),    # W: VMEM-resident
                    pl.BlockSpec((1, Np), lambda i: (0, 0)),    # b: VMEM-resident
                ],
                out_specs=pl.BlockSpec((tb, Np), lambda i: (i, 0)),
            ),
            compiler_params=pltpu.CompilerParams(
                # Hint only on single-TC chips; see TODO at top for v7x CORE_PARALLEL.
                dimension_semantics=("parallel",),
            ),
        )(x2d, w_pad, b_pad)

    if trim_output:
        return out_full[:, :out_dim]
    return out_full


if __name__ == "__main__":
    # Module defaults: input_dim = 28*28 = 784, output_dim = 10.
    B, C, H, W = 8, 1, 28, 28
    in_dim, out_dim = C * H * W, 10

    key = jax.random.PRNGKey(0)
    kx, kw, kb = jax.random.split(key, 3)

    # Deterministic parameter init mimicking nn.Linear's U(-1/sqrt(in), 1/sqrt(in)).
    bound = 1.0 / (in_dim ** 0.5)
    weight = jax.random.uniform(kw, (out_dim, in_dim), jnp.float32, -bound, bound)
    bias = jax.random.uniform(kb, (out_dim,), jnp.float32, -bound, bound)
    x = jax.random.normal(kx, (B, C, H, W), jnp.float32)

    w_pad, b_pad = prepare_params(weight, bias)       # one-time init cost

    ref = jnp.dot(x.reshape(B, -1), weight.T,
                  precision=jax.lax.Precision.HIGHEST) + bias

    # 1) Force the Pallas path at the small deployment shape (single-block grid).
    out = simple_linear_classifier_forward(x, w_pad, b_pad, out_dim,
                                           small_batch_xla_cutoff=0)
    out = jax.block_until_ready(out)
    assert out.shape == (B, out_dim)
    assert jnp.allclose(out, ref, atol=2e-2, rtol=2e-2)

    # 2) Multi-step grid with a ragged final block (B=40, tb=16 -> 3 blocks, last has 8 rows).
    B2 = 40
    x2 = jax.random.normal(kx, (B2, C, H, W), jnp.float32)
    ref2 = jnp.dot(x2.reshape(B2, -1), weight.T,
                   precision=jax.lax.Precision.HIGHEST) + bias
    out2 = simple_linear_classifier_forward(x2, w_pad, b_pad, out_dim,
                                            tb=16, small_batch_xla_cutoff=0)
    out2 = jax.block_until_ready(out2)
    assert out2.shape == (B2, out_dim)
    assert jnp.allclose(out2, ref2, atol=2e-2, rtol=2e-2)

    # 3) Default small-batch XLA fast path (B=8 <= cutoff).
    out3 = jax.block_until_ready(
        simple_linear_classifier_forward(x, w_pad, b_pad, out_dim))
    assert jnp.allclose(out3, ref, atol=2e-2, rtol=2e-2)

    print("KERNEL_OK")
</pallas_src>

<mosaic_0001>
module attributes {stable_mosaic.version = 11 : i64} {
  func.func @_linear_kernel(%arg0: i32, %arg1: memref<8x784xf32, #tpu.memory_space<vmem>>, %arg2: memref<784x128xf32, #tpu.memory_space<vmem>>, %arg3: memref<1x128xf32, #tpu.memory_space<vmem>>, %arg4: memref<8x128xf32, #tpu.memory_space<vmem>>) attributes {dimension_semantics = [#tpu.dimension_semantics<parallel>], iteration_bounds = array<i64: 1>, scalar_prefetch = 0 : i64, scratch_operands = 0 : i64, tpu.core_type = #tpu.core_type<tc>, window_params = [{transform_indices = @transform_0, window_bounds = array<i64: 8, 784>}, {pipeline_mode = #tpu.pipeline_mode<synchronous>, transform_indices = @transform_1, window_bounds = array<i64: 784, 128>}, {pipeline_mode = #tpu.pipeline_mode<synchronous>, transform_indices = @transform_2, window_bounds = array<i64: 1, 128>}, {transform_indices = @transform_3, window_bounds = array<i64: 8, 128>}]} {
    %c0 = arith.constant 0 : index
    %c0_0 = arith.constant 0 : index
    %0 = vector.load %arg1[%c0, %c0_0] : memref<8x784xf32, #tpu.memory_space<vmem>>, vector<8x784xf32>
    %c0_1 = arith.constant 0 : index
    %c0_2 = arith.constant 0 : index
    %1 = vector.load %arg2[%c0_1, %c0_2] : memref<784x128xf32, #tpu.memory_space<vmem>>, vector<784x128xf32>
    %cst = arith.constant dense<0.000000e+00> : vector<8x128xf32>
    %2 = tpu.matmul %0, %1, %cst {dimension_numbers = #tpu.dot_dimension_numbers<[1], [0], [0], [1], [0, 0, 1, 1], [], []>} : vector<8x784xf32>, vector<784x128xf32>, vector<8x128xf32> -> vector<8x128xf32>
    %c0_3 = arith.constant 0 : index
    %c0_4 = arith.constant 0 : index
    %3 = vector.load %arg3[%c0_3, %c0_4] : memref<1x128xf32, #tpu.memory_space<vmem>>, vector<1x128xf32>
    %4 = vector.broadcast %3 : vector<1x128xf32> to vector<8x128xf32>
    %5 = arith.addf %2, %4 : vector<8x128xf32>
    %c0_5 = arith.constant 0 : index
    %c0_6 = arith.constant 0 : index
    %6 = vector.load %arg4[%c0_5, %c0_6] : memref<8x128xf32, #tpu.memory_space<vmem>>, vector<8x128xf32>
    tpu.vector_store %arg4[%c0_5, %c0_6], %5 {strides = array<i32>} : memref<8x128xf32, #tpu.memory_space<vmem>>, vector<8x128xf32>,
    return
  }
  func.func @transform_0(%arg0: i32) -> (i32, i32) {
    %c0_i32 = arith.constant 0 : i32
    %c0_i32_0 = arith.constant 0 : i32
    return %arg0, %c0_i32 : i32, i32
  }
  func.func @transform_1(%arg0: i32) -> (i32, i32) {
    %c0_i32 = arith.constant 0 : i32
    %c0_i32_0 = arith.constant 0 : i32
    %c0_i32_1 = arith.constant 0 : i32
    return %c0_i32, %c0_i32_0 : i32, i32
  }
  func.func @transform_2(%arg0: i32) -> (i32, i32) {
    %c0_i32 = arith.constant 0 : i32
    %c0_i32_0 = arith.constant 0 : i32
    %c0_i32_1 = arith.constant 0 : i32
    return %c0_i32, %c0_i32_0 : i32, i32
  }
  func.func @transform_3(%arg0: i32) -> (i32, i32) {
    %c0_i32 = arith.constant 0 : i32
    %c0_i32_0 = arith.constant 0 : i32
    return %arg0, %c0_i32 : i32, i32
  }
}

</mosaic_0001>

<bundles_post_ra>
// kernel: tpu_custom_call.1
= control target key start
LH: loop header
LB: loop body
LE: loop exit
PB: predicated region body
PF: predicated region fallthrough
CT: control target
= control target key end

     0   :  { %8 = vsyncpa [#allocation3], 0  ;;  %s683_s0 = inlined_call_operand.hbm [shape: f32[8,784], index: 0, kind: input, shape index: {}]   ;;  %s684_s1 = inlined_call_operand.hbm [shape: f32[784,128], index: 1, kind: input, shape index: {}]   ;;  %s685_s2 = inlined_call_operand.vmem [shape: f32[1,128], index: 2, kind: input, shape index: {}]   ;;  %s686_s3 = inlined_call_operand.hbm [shape: f32[8,128], index: 3, kind: output, shape index: {}]  }
   0x1   :  { %9 = vsyncpa [#allocation6], 0 }
   0x2   :  { %10 = vsyncpa [#allocation4], 0  ;;  %s644_s12 = smov [#allocation2]   ;;  %s645_s14 = smov [#allocation5]  }
   0x3   :  { %s17_s13 = sshll.u32 %s644_s12, 4  ;;  %s26_s15 = sshll.u32 %s645_s14, 4  ;;  %s18_s13 = int_to_ptr.vmem [resolvable:$true] %s17_s13  ;;  %s27_s15 = int_to_ptr.vmem [resolvable:$true] %s26_s15 }
   0x4   :  { %s586_s16 = scalar_lea.vmem %s18_s13, 896  ;;  %p591_p1 = scmp.lt.s32.totalorder %s18_s13, %s18_s13 }
   0x5   :  { %p587_p0 = scmp.ne.s32.totalorder %s18_s13, %s586_s16  ;;  %p592_p2 = scmp.lt.s32.totalorder %s586_s16, %s586_s16 }
   0x7   :  { %p593_p3 = por %p592_p2, %p591_p1 }
   0x9   :  { %p594_p4 = pnand %p593_p3, %p587_p0 }
   0xb   :  { %597 = shalt.err (!%p594_p4)
}
   0xc   :  { %20 = dma.hbm_to_vmem [thread:$0]  %s683_s0, 896, %s18_s13, [#allocation3]  }
   0xd   :  { %s606_s19 = scalar_lea.vmem %s27_s15, 12544  ;;  %p611_p6 = scmp.lt.s32.totalorder %s27_s15, %s27_s15 }
   0xe   :  { %p607_p5 = scmp.ne.s32.totalorder %s27_s15, %s606_s19  ;;  %p612_p7 = scmp.lt.s32.totalorder %s606_s19, %s606_s19 }
  0x10   :  { %p613_p8 = por %p612_p7, %p611_p6 }
  0x12   :  { %p614_p9 = pnand %p613_p8, %p607_p5 }
  0x14   :  { %617 = shalt.err (!%p614_p9)
}
  0x15   :  { %s646_s20 = smov 128   ;;  %s647_s21 = smov 8  }
  0x16   :  { %32 = dma.hbm_to_vmem [thread:$0]  %s684_s1, 12544, %s27_s15, [#allocation6], %s646_s20, %s646_s20, %s647_s21  }
  0x17   :  { %638 = dma.done.wait [#allocation3], 896  }
  0x18   :  { %639 = vsyncadd [#allocation3], 4294966400 }
  0x19   :  { %640 = dma.done.wait [#allocation6], 12544  }
  0x1a   :  { %641 = vsyncadd [#allocation6], 4294954752  ;;  %v79_v0 = vld [vmem:[#allocation5 + $0xf8] sm:$0xff]  ;;  %v78_v2 = vld [vmem:[#allocation5 + $0xf0] sm:$0xff]  ;;  %vm153_vm0 = vcmask 130048   ;;  %vm649_vm1 = vmmov 0  }
  0x1b   :  { %v63_v1 = vld [vmem:[#allocation5 + $0x78] sm:$0xff]  ;;  %456 = vmatprep.subr.mxu0 %v79_v0  ;;  %v62_v4 = vld [vmem:[#allocation5 + $0x70] sm:$0xff]  ;;  %v77_v6 = vld [vmem:[#allocation5 + $0xe8] sm:$0xff]  ;;  %s650_s24 = smov [#allocation7]  }
  0x1c   :  { %v111_v3 = vld [vmem:[#allocation5 + $0x1f8] sm:$0xff]  ;;  %457 = vmatpush3.msra.mxu0 %v63_v1  ;;  %v110_v7 = vld [vmem:[#allocation5 + $0x1f0] sm:$0xff]  ;;  %v61_v8 = vld [vmem:[#allocation5 + $0x68] sm:$0xff]  ;;  %s444_s25 = sshll.u32 %s650_s24, 4  ;;  %s445_s25 = int_to_ptr.vmem [resolvable:$true] %s444_s25 }
  0x1d   :  { %v95_v5 = vld [vmem:[#allocation5 + $0x178] sm:$0xff]  ;;  %491 = vmatprep.subr.mxu1 %v111_v3  ;;  %458 = vmatprep.subr.mxu0 %v78_v2  ;;  %v94_v9 = vld [vmem:[#allocation5 + $0x170] sm:$0xff]  ;;  %v109_v10 = vld [vmem:[#allocation5 + $0x1e8] sm:$0xff]  ;;  %s618_s26 = scalar_lea.vmem %s445_s25, 128  ;;  %p623_p11 = scmp.lt.s32.totalorder %s445_s25, %s445_s25 }
  0x1e   :  { %492 = vmatpush3.msra.mxu1 %v95_v5  ;;  %459 = vmatpush3.msra.mxu0 %v62_v4  ;;  %v76_v11 = vld [vmem:[#allocation5 + $0xe0] sm:$0xff]  ;;  %v93_v12 = vld [vmem:[#allocation5 + $0x168] sm:$0xff]  ;;  %v75_v15 = vld [vmem:[#allocation5 + $0xd8] sm:$0xff]  ;;  %p619_p10 = scmp.ne.s32.totalorder %s445_s25, %s618_s26  ;;  %p624_p12 = scmp.lt.s32.totalorder %s618_s26, %s618_s26 }
  0x1f   :  { %493 = vmatprep.subr.mxu1 %v110_v7  ;;  %460 = vmatprep.subr.mxu0 %v77_v6  ;;  %v60_v13 = vld [vmem:[#allocation5 + $0x60] sm:$0xff]  ;;  %v59_v17 = vld [vmem:[#allocation5 + $0x58] sm:$0xff]  ;;  %v74_v19 = vld [vmem:[#allocation5 + $0xd0] sm:$0xff] }
  0x20   :  { %494 = vmatpush3.msra.mxu1 %v94_v9  ;;  %v108_v14 = vld [vmem:[#allocation5 + $0x1e0] sm:$0xff]  ;;  %461 = vmatpush3.msra.mxu0 %v61_v8  ;;  %v107_v18 = vld [vmem:[#allocation5 + $0x1d8] sm:$0xff]  ;;  %v58_v21 = vld [vmem:[#allocation5 + $0x50] sm:$0xff]  ;;  %p625_p13 = por %p624_p12, %p623_p11 }
  0x21   :  { %495 = vmatprep.subr.mxu1 %v109_v10  ;;  %v92_v16 = vld [vmem:[#allocation5 + $0x160] sm:$0xff]  ;;  %462 = vmatprep.subr.mxu0 %v76_v11  ;;  %v91_v20 = vld [vmem:[#allocation5 + $0x158] sm:$0xff]  ;;  %v106_v22 = vld [vmem:[#allocation5 + $0x1d0] sm:$0xff] }
  0x22   :  { %496 = vmatpush3.msra.mxu1 %v93_v12  ;;  %463 = vmatpush3.msra.mxu0 %v60_v13  ;;  %v73_v23 = vld [vmem:[#allocation5 + $0xc8] sm:$0xff]  ;;  %v90_v24 = vld [vmem:[#allocation5 + $0x150] sm:$0xff]  ;;  %v72_v27 = vld [vmem:[#allocation5 + $0xc0] sm:$0xff]  ;;  %p626_p0 = pnand %p625_p13, %p619_p10 }
  0x23   :  { %497 = vmatprep.subr.mxu1 %v108_v14  ;;  %464 = vmatprep.subr.mxu0 %v75_v15  ;;  %v57_v25 = vld [vmem:[#allocation5 + $0x48] sm:$0xff]  ;;  %v56_v29 = vld [vmem:[#allocation5 + $0x40] sm:$0xff]  ;;  %v71_v31 = vld [vmem:[#allocation5 + $0xb8] sm:$0xff]  ;;  %v648_v14 = vmov 0.0  }
  0x24   :  { %498 = vmatpush3.msra.mxu1 %v92_v16  ;;  %465 = vmatpush3.msra.mxu0 %v59_v17  ;;  %v105_v26 = vld [vmem:[#allocation5 + $0x1c8] sm:$0xff]  ;;  %v104_v30 = vld [vmem:[#allocation5 + $0x1c0] sm:$0xff]  ;;  %v55_v33 = vld [vmem:[#allocation5 + $0x38] sm:$0xff] }
  0x25   :  { %499 = vmatprep.subr.mxu1 %v107_v18  ;;  %466 = vmatprep.subr.mxu0 %v74_v19  ;;  %v89_v28 = vld [vmem:[#allocation5 + $0x148] sm:$0xff]  ;;  %v88_v32 = vld [vmem:[#allocation5 + $0x140] sm:$0xff]  ;;  %v103_v34 = vld [vmem:[#allocation5 + $0x1b8] sm:$0xff] }
  0x26   :  { %500 = vmatpush3.msra.mxu1 %v91_v20  ;;  %467 = vmatpush3.msra.mxu0 %v58_v21  ;;  %v70_v35 = vld [vmem:[#allocation5 + $0xb0] sm:$0xff]  ;;  %v87_v36 = vld [vmem:[#allocation5 + $0x138] sm:$0xff]  ;;  %v69_v39 = vld [vmem:[#allocation5 + $0xa8] sm:$0xff] }
  0x27   :  { %501 = vmatprep.subr.mxu1 %v106_v22  ;;  %468 = vmatprep.subr.mxu0 %v73_v23  ;;  %v54_v37 = vld [vmem:[#allocation5 + $0x30] sm:$0xff]  ;;  %v53_v41 = vld [vmem:[#allocation5 + $0x28] sm:$0xff]  ;;  %v68_v43 = vld [vmem:[#allocation5 + $0xa0] sm:$0xff] }
  0x28   :  { %502 = vmatpush3.msra.mxu1 %v90_v24  ;;  %469 = vmatpush3.msra.mxu0 %v57_v25  ;;  %v102_v38 = vld [vmem:[#allocation5 + $0x1b0] sm:$0xff]  ;;  %v101_v42 = vld [vmem:[#allocation5 + $0x1a8] sm:$0xff]  ;;  %v52_v45 = vld [vmem:[#allocation5 + $0x20] sm:$0xff] }
  0x29   :  { %503 = vmatprep.subr.mxu1 %v105_v26  ;;  %470 = vmatprep.subr.mxu0 %v72_v27  ;;  %v86_v40 = vld [vmem:[#allocation5 + $0x130] sm:$0xff]  ;;  %v85_v44 = vld [vmem:[#allocation5 + $0x128] sm:$0xff]  ;;  %v100_v46 = vld [vmem:[#allocation5 + $0x1a0] sm:$0xff] }
  0x2a   :  { %504 = vmatpush3.msra.mxu1 %v89_v28  ;;  %471 = vmatpush3.msra.mxu0 %v56_v29  ;;  %v67_v47 = vld [vmem:[#allocation5 + $0x98] sm:$0xff]  ;;  %v84_v48 = vld [vmem:[#allocation5 + $0x120] sm:$0xff]  ;;  %v66_v51 = vld [vmem:[#allocation5 + $0x90] sm:$0xff] }
  0x2b   :  { %505 = vmatprep.subr.mxu1 %v104_v30  ;;  %472 = vmatprep.subr.mxu0 %v71_v31  ;;  %v51_v49 = vld [vmem:[#allocation5 + $0x18] sm:$0xff]  ;;  %v50_v53 = vld [vmem:[#allocation5 + $0x10] sm:$0xff]  ;;  %v65_v55 = vld [vmem:[#allocation5 + $0x88] sm:$0xff] }
  0x2c   :  { %506 = vmatpush3.msra.mxu1 %v88_v32  ;;  %473 = vmatpush3.msra.mxu0 %v55_v33  ;;  %v99_v50 = vld [vmem:[#allocation5 + $0x198] sm:$0xff]  ;;  %v98_v54 = vld [vmem:[#allocation5 + $0x190] sm:$0xff]  ;;  %v49_v57 = vld [vmem:[#allocation5 + $0x8] sm:$0xff] }
  0x2d   :  { %507 = vmatprep.subr.mxu1 %v103_v34  ;;  %474 = vmatprep.subr.mxu0 %v70_v35  ;;  %v83_v52 = vld [vmem:[#allocation5 + $0x118] sm:$0xff]  ;;  %v82_v56 = vld [vmem:[#allocation5 + $0x110] sm:$0xff]  ;;  %v97_v58 = vld [vmem:[#allocation5 + $0x188] sm:$0xff] }
  0x2e   :  { %508 = vmatpush3.msra.mxu1 %v87_v36  ;;  %475 = vmatpush3.msra.mxu0 %v54_v37  ;;  %v64_v59 = vld [vmem:[#allocation5 + $0x80] sm:$0xff]  ;;  %v42_v60 = vld [vmem:[#allocation2 + $0x8] sm:$0xff]  ;;  %v81_v62 = vld [vmem:[#allocation5 + $0x108] sm:$0xff] }
  0x2f   :  { %509 = vmatprep.subr.mxu1 %v102_v38  ;;  %476 = vmatprep.subr.mxu0 %v69_v39  ;;  %v48_v61 = vld [vmem:[#allocation5] sm:$0xff]  ;;  %v41_v63 = vld [vmem:[#allocation2] sm:$0xff]  ;;  %v143_v1 = vld [vmem:[#allocation5 + $0x2f8] sm:$0xff] }
  0x30   :  { %510 = vmatpush3.msra.mxu1 %v86_v40  ;;  %477 = vmatpush3.msra.mxu0 %v53_v41  ;;  %v96_v0 = vld [vmem:[#allocation5 + $0x180] sm:$0xff]  ;;  %v127_v4 = vld [vmem:[#allocation5 + $0x278] sm:$0xff]  ;;  %v142_v6 = vld [vmem:[#allocation5 + $0x2f0] sm:$0xff] }
  0x31   :  { %511 = vmatprep.subr.mxu1 %v101_v42  ;;  %478 = vmatprep.subr.mxu0 %v68_v43  ;;  %v80_v2 = vld [vmem:[#allocation5 + $0x100] sm:$0xff]  ;;  %v43_v5 = vld [vmem:[#allocation2 + $0x10] sm:$0xff]  ;;  %v126_v7 = vld [vmem:[#allocation5 + $0x270] sm:$0xff] }
  0x32   :  { %512 = vmatpush3.msra.mxu1 %v85_v44  ;;  %479 = vmatpush3.msra.mxu0 %v52_v45  ;;  %v44_v3 = vld [vmem:[#allocation2 + $0x18] sm:$0xff]  ;;  %v46_v8 = vld [vmem:[#allocation2 + $0x28] sm:$0xff]  ;;  %v141_v9 = vld [vmem:[#allocation5 + $0x2e8] sm:$0xff] }
  0x33   :  { %513 = vmatprep.subr.mxu1 %v100_v46  ;;  %480 = vmatprep.subr.mxu0 %v67_v47  ;;  %v125_v10 = vld [vmem:[#allocation5 + $0x268] sm:$0xff]  ;;  %v140_v12 = vld [vmem:[#allocation5 + $0x2e0] sm:$0xff]  ;;  %v139_v16 = vld [vmem:[#allocation5 + $0x2d8] sm:$0xff] }
  0x34   :  { %514 = vmatpush3.msra.mxu1 %v84_v48  ;;  %481 = vmatpush3.msra.mxu0 %v51_v49  ;;  %v145_v11 = vld [vmem:[#allocation5 + $0x308] sm:$0xff]  ;;  %v124_v13 = vld [vmem:[#allocation5 + $0x260] sm:$0xff]  ;;  %v123_v17 = vld [vmem:[#allocation5 + $0x258] sm:$0xff] }
  0x35   :  { %515 = vmatprep.subr.mxu1 %v99_v50  ;;  %482 = vmatprep.subr.mxu0 %v66_v51  ;;  %v144_v15 = vld [vmem:[#allocation5 + $0x300] sm:$0xff]  ;;  %v47_v18 = vld [vmem:[#allocation2 + $0x30] sm:$0xff]  ;;  %v138_v19 = vld [vmem:[#allocation5 + $0x2d0] sm:$0xff] }
  0x36   :  { %516 = vmatpush3.msra.mxu1 %v83_v52  ;;  %483 = vmatpush3.msra.mxu0 %v50_v53  ;;  %v122_v20 = vld [vmem:[#allocation5 + $0x250] sm:$0xff]  ;;  %v137_v21 = vld [vmem:[#allocation5 + $0x2c8] sm:$0xff]  ;;  %v136_v23 = vld [vmem:[#allocation5 + $0x2c0] sm:$0xff] }
  0x37   :  { %517 = vmatprep.subr.mxu1 %v98_v54  ;;  %484 = vmatprep.subr.mxu0 %v65_v55  ;;  %v121_v22 = vld [vmem:[#allocation5 + $0x248] sm:$0xff]  ;;  %v120_v24 = vld [vmem:[#allocation5 + $0x240] sm:$0xff]  ;;  %v135_v25 = vld [vmem:[#allocation5 + $0x2b8] sm:$0xff] }
  0x38   :  { %518 = vmatpush3.msra.mxu1 %v82_v56  ;;  %485 = vmatpush3.msra.mxu0 %v49_v57  ;;  %v119_v26 = vld [vmem:[#allocation5 + $0x238] sm:$0xff]  ;;  %v134_v27 = vld [vmem:[#allocation5 + $0x2b0] sm:$0xff]  ;;  %v133_v29 = vld [vmem:[#allocation5 + $0x2a8] sm:$0xff] }
  0x39   :  { %519 = vmatprep.subr.mxu1 %v97_v58  ;;  %486 = vmatprep.subr.mxu0 %v64_v59  ;;  %v118_v28 = vld [vmem:[#allocation5 + $0x230] sm:$0xff]  ;;  %v117_v30 = vld [vmem:[#allocation5 + $0x228] sm:$0xff]  ;;  %v132_v31 = vld [vmem:[#allocation5 + $0x2a0] sm:$0xff] }
  0x3a   :  { %221 = vmatprep.mubr.f32.mxu0 %v42_v60  ;;  %487 = vmatpush3.msra.mxu0 %v48_v61  ;;  %v116_v32 = vld [vmem:[#allocation5 + $0x220] sm:$0xff]  ;;  %v131_v33 = vld [vmem:[#allocation5 + $0x298] sm:$0xff]  ;;  %v130_v35 = vld [vmem:[#allocation5 + $0x290] sm:$0xff] }
  0x3b   :  { %520 = vmatpush3.msra.mxu1 %v81_v62  ;;  %222 = vmatmul.mubr.f32.vlgmr.msra.gmra.mxu0 %v41_v63  ;;  %v115_v34 = vld [vmem:[#allocation5 + $0x218] sm:$0xff]  ;;  %v114_v36 = vld [vmem:[#allocation5 + $0x210] sm:$0xff]  ;;  %v129_v37 = vld [vmem:[#allocation5 + $0x288] sm:$0xff] }
  0x3c   :  { %521 = vmatprep.subr.mxu1 %v96_v0  ;;  %526 = vmatprep.subr.mxu0 %v143_v1  ;;  %v113_v38 = vld [vmem:[#allocation5 + $0x208] sm:$0xff]  ;;  %v128_v39 = vld [vmem:[#allocation5 + $0x280] sm:$0xff] }
  0x3d   :  { %522 = vmatpush3.msra.mxu1 %v80_v2  ;;  %291 = vmatprep.mubr.f32.mxu1 %v44_v3  ;;  %v112_v40 = vld [vmem:[#allocation5 + $0x200] sm:$0xff]  ;;  %v45_v41 = vld [vmem:[#allocation2 + $0x20] sm:$0xff] }
  0x3e   :  { %527 = vmatpush3.msra.mxu0 %v127_v4  ;;  %292 = vmatmul.mubr.f32.vlgmr.msra.gmra.mxu1 %v43_v5  ;;  %v454_v49 = vld [vmem:[%s685_s2] ss:$0 sm:$0xff] }
  0x3f   :  { %528 = vmatprep.subr.mxu0 %v142_v6  ;;  %361 = vmatprep.mubr.f32.mxu0 %v46_v8 }
  0x40   :  { %529 = vmatpush3.msra.mxu0 %v126_v7  ;;  %564 = vmatprep.subr.mxu1 %v648_v14 }
  0x41   :  { %530 = vmatprep.subr.mxu0 %v141_v9  ;;  %565 = vmatpush3.msra.mxu1 %v145_v11 }
  0x42   :  { %531 = vmatpush3.msra.mxu0 %v125_v10  ;;  %566 = vmatprep.subr.mxu1 %v648_v14 }
  0x43   :  { %532 = vmatprep.subr.mxu0 %v140_v12  ;;  %567 = vmatpush3.msra.mxu1 %v144_v15 }
  0x44   :  { %533 = vmatpush3.msra.mxu0 %v124_v13  ;;  %568 = vmatprep.mubr.msk.f32.mxu1 %vm649_vm1, %v648_v14 }
  0x45   :  { %534 = vmatprep.subr.mxu0 %v139_v16  ;;  %569 = vmatmul.mubr.msk.f32.vlgmr.msra.gmra.mxu1 %vm153_vm0, %v47_v18 }
  0x46   :  { %535 = vmatpush3.msra.mxu0 %v123_v17 }
  0x47   :  { %536 = vmatprep.subr.mxu0 %v138_v19 }
  0x48   :  { %537 = vmatpush3.msra.mxu0 %v122_v20 }
  0x49   :  { %538 = vmatprep.subr.mxu0 %v137_v21 }
  0x4a   :  { %539 = vmatpush3.msra.mxu0 %v121_v22 }
  0x4b   :  { %540 = vmatprep.subr.mxu0 %v136_v23 }
  0x4c   :  { %541 = vmatpush3.msra.mxu0 %v120_v24 }
  0x4d   :  { %542 = vmatprep.subr.mxu0 %v135_v25 }
  0x4e   :  { %543 = vmatpush3.msra.mxu0 %v119_v26 }
  0x4f   :  { %544 = vmatprep.subr.mxu0 %v134_v27 }
  0x50   :  { %545 = vmatpush3.msra.mxu0 %v118_v28 }
  0x51   :  { %546 = vmatprep.subr.mxu0 %v133_v29 }
  0x52   :  { %547 = vmatpush3.msra.mxu0 %v117_v30 }
  0x53   :  { %548 = vmatprep.subr.mxu0 %v132_v31 }
  0x54   :  { %549 = vmatpush3.msra.mxu0 %v116_v32 }
  0x55   :  { %550 = vmatprep.subr.mxu0 %v131_v33 }
  0x56   :  { %551 = vmatpush3.msra.mxu0 %v115_v34 }
  0x57   :  { %552 = vmatprep.subr.mxu0 %v130_v35 }
  0x58   :  { %553 = vmatpush3.msra.mxu0 %v114_v36 }
  0x59   :  { %554 = vmatprep.subr.mxu0 %v129_v37 }
  0x5a   :  { %555 = vmatpush3.msra.mxu0 %v113_v38 }
  0x5b   :  { %556 = vmatprep.subr.mxu0 %v128_v39 }
  0x5c   :  { %557 = vmatpush3.msra.mxu0 %v112_v40 }
  0x5d   :  { %362 = vmatmul.mubr.f32.vlgmr.msra.gmra.mxu0 %v45_v41 }
  0xfb   :  { %v488_v46 = vpop.f32.mrf.mxu0 }
  0xfd   :  { %v489_v47 = vpop.f32.mrf.mxu0 }
  0xfe   :  { %v523_v42 = vpop.f32.mrf.mxu1  ;;  %v490_v48 = vadd.f32 %v489_v47, %v488_v46 }
 0x100   :  { %v524_v43 = vpop.f32.mrf.mxu1  ;;  %v224_v50 = vadd.f32 %v490_v48, %v454_v49 }
 0x101   :  { %v525_v51 = vadd.f32 %v524_v43, %v523_v42 }
 0x103   :  { %v294_v54 = vadd.f32 %v525_v51, %v224_v50 }
 0x105   :  { %v433_v44 = vpop.f32.mrf.mxu1 }
 0x107   :  { %v570_v45 = vpop.f32.mrf.mxu1 }
 0x11d   :  { %v558_v52 = vpop.f32.mrf.mxu0 }
 0x11f   :  { %v559_v53 = vpop.f32.mrf.mxu0 }
 0x120   :  { %v560_v55 = vadd.f32 %v559_v53, %v558_v52 }
 0x122   :  { %v364_v56 = vadd.f32 %v560_v55, %v294_v54 }
 0x124   :  { %v434_v57 = vadd.f32 %v433_v44, %v364_v56 }
 0x126   :  { %437 = vst [vmem:[#allocation7] sm:$0xff] %v434_v57 }
 0x127   :  { %629 = shalt.err (!%p626_p0)
}
 0x128   :  { %447 = dma.vmem_to_hbm [thread:$0]  %s445_s25, 128, %s686_s3, [#allocation4]  }
 0x129   :  { %642 = dma.done.wait [#allocation4], 128  }
 0x12a   :  { %643 = vsyncadd [#allocation4], 4294967168 }
 0x12b   :  { %451 = vsyncpa [#allocation3], 1 }
 0x12c   :  { %452 = vsyncpa [#allocation6], 1 }
 0x12d   :  { %453 = vsyncpa [#allocation4], 1 }

</bundles_post_ra>
